<compile_context>
chip_gen: v7x
topology: tpu7x:2x2x1
jax: 0.10.0
libtpu: 0.0.40
codegen_flags: <defaults>
</compile_context>

<pallas_src>
import functools

import jax
import jax.numpy as jnp
from jax.experimental import pallas as pl
from jax.experimental.pallas import tpu as pltpu


def _round_up(x, m):
    return ((x + m - 1) // m) * m


def _attention_kernel(hemb_ref, pf_ref, f_ref, mbias_ref, wa_ref,
                      vis_ref, pi_ref, *, compute_dtype):
    # Block shapes (Bt = batch tile):
    #   hemb_ref : (Bt, A)       f32
    #   pf_ref   : (Bt, L, A)    f32 / bf16
    #   f_ref    : (Bt, L, D)    f32 / bf16
    #   mbias_ref: (Bt, L)       f32  additive mask bias (0 or -1e9)
    #   wa_ref   : (1, A)        f32
    #   vis_ref  : (Bt, D_out)   f32  (D_out = round_up(D, 128))
    #   pi_ref   : (Bt, L_out)   f32  (L_out = round_up(L, 128))
    cdt = compute_dtype
    Bt, L, A = pf_ref.shape
    D = f_ref.shape[2]
    L_out = pi_ref.shape[1]
    D_out = vis_ref.shape[1]

    h_emb = hemb_ref[...].astype(cdt)                         # (Bt, A)
    pf = pf_ref[...].astype(cdt)                              # (Bt, L, A)
    hA = jnp.tanh(pf + h_emb[:, None, :])                     # (Bt, L, A)  EUP

    # alpha_net as VPU multiply + lane reduce with f32 accumulation.
    wa = wa_ref[...].astype(cdt)                              # (1, A)
    scores = jnp.sum(hA * wa[None, :, :], axis=-1,
                     dtype=jnp.float32)                       # (Bt, L) f32
    # masked_fill(masks == 0, -1e9) as additive bias on f32 scores.
    scores = scores + mbias_ref[...]

    # Softmax over L (lane reduce); EUP approx reciprocal (~1e-3 rel. error).
    s_max = jnp.max(scores, axis=-1, keepdims=True)
    e = jnp.exp(scores - s_max)
    inv = pl.reciprocal(jnp.sum(e, axis=-1, keepdims=True), approx=True)
    pi = e * inv                                              # (Bt, L) f32

    # visAtt = sum_L PI * feats (VPU multiply + sublane reduce, f32 accum).
    f = f_ref[...].astype(cdt)                                # (Bt, L, D)
    vis = jnp.sum(pi.astype(cdt)[:, :, None] * f, axis=1,
                  dtype=jnp.float32)                          # (Bt, D)

    # Lane-dense stores: pad last dims up to 128-multiples (no masked vst).
    if L_out > L:
        pi = jnp.concatenate(
            [pi, jnp.zeros((Bt, L_out - L), jnp.float32)], axis=-1)
    if D_out > D:
        vis = jnp.concatenate(
            [vis, jnp.zeros((Bt, D_out - D), jnp.float32)], axis=-1)
    pi_ref[...] = pi.astype(pi_ref.dtype)
    vis_ref[...] = vis.astype(vis_ref.dtype)


def attention_pallas(h, feats, p_feats, masks, Wh, bh, wa, ba,
                     *, b_tile=None, compute_dtype=None, vmem_limit_bytes=None):
    """Attention forward. Returns (visAtt (B, D), PI (B, L)).

    feats / p_feats may be passed already-cast to bf16 by the caller (halves
    the dominant HBM traffic); this wrapper performs no dtype conversion on
    them.
    """
    B, R = h.shape
    _, L, D = feats.shape
    A = Wh.shape[1]

    device_kind = ""
    try:
        device_kind = jax.devices()[0].device_kind.lower()
    except Exception:
        pass

    # Hoisted tiny (B, R) @ (R, A) GEMM — one XLA matmul for the whole batch.
    h_emb = (h.astype(jnp.float32) @ Wh.astype(jnp.float32)
             + bh.reshape(1, A).astype(jnp.float32))          # (B, A)

    if masks is None:
        mask_bias = jnp.zeros((B, L), jnp.float32)
    else:
        mask_bias = jnp.where(masks.reshape(B, L) == 0, -1.0e9, 0.0
                              ).astype(jnp.float32)

    wa_row = wa.reshape(1, A).astype(jnp.float32)
    del ba  # alpha_net bias is softmax-invariant.

    # bf16 elementwise compute on v6e/v7x when features are bf16; f32 on v5e
    # (no bf16 VPU/EUP there).
    if compute_dtype is None:
        if ("v5" not in device_kind) and feats.dtype == jnp.bfloat16:
            compute_dtype = jnp.bfloat16
        else:
            compute_dtype = jnp.float32

    # Per-generation VMEM budget.
    if vmem_limit_bytes is None:
        try:
            phys = pltpu.get_tpu_info().vmem_capacity_bytes
        except Exception:
            phys = 64 * 1024 * 1024
        vmem_limit_bytes = min(int(0.75 * phys), 100 * 1024 * 1024)

    L_out = _round_up(max(L, 1), 128)
    D_out = _round_up(max(D, 1), 128)

    if b_tile is None:
        itm_pf = jnp.dtype(p_feats.dtype).itemsize
        itm_f = jnp.dtype(feats.dtype).itemsize
        # Double-buffered VMEM bytes per batch row (feature streams dominate).
        bytes_per_row = (2 * L * (A * itm_pf + D * itm_f)
                         + 2 * 4 * (A + L + L_out + D_out))
        bt = max(int(0.8 * vmem_limit_bytes) // max(bytes_per_row, 1), 1)
        if "v7" in device_kind and B >= 16:
            # 2 TensorCores/chip: keep >= 2 blocks on the parallel batch axis.
            bt = min(bt, _round_up((B + 1) // 2, 8))
        if bt >= B:
            bt = B
        else:
            bt = max((bt // 8) * 8, 8)
        b_tile = min(bt, B)

    grid_b = pl.cdiv(B, b_tile)   # ragged last block handled by Pallas.

    kernel = functools.partial(_attention_kernel, compute_dtype=compute_dtype)

    vis, pi = pl.pallas_call(
        kernel,
        out_shape=(jax.ShapeDtypeStruct((B, D_out), jnp.float32),
                   jax.ShapeDtypeStruct((B, L_out), jnp.float32)),
        grid=(grid_b,),
        in_specs=[
            pl.BlockSpec((b_tile, A), lambda b: (b, 0)),          # h_emb
            pl.BlockSpec((b_tile, L, A), lambda b: (b, 0, 0)),    # p_feats
            pl.BlockSpec((b_tile, L, D), lambda b: (b, 0, 0)),    # feats
            pl.BlockSpec((b_tile, L), lambda b: (b, 0)),          # mask bias
            pl.BlockSpec((1, A), lambda b: (0, 0)),               # alpha_net w
        ],
        out_specs=(
            pl.BlockSpec((b_tile, D_out), lambda b: (b, 0)),      # visAtt
            pl.BlockSpec((b_tile, L_out), lambda b: (b, 0)),      # PI
        ),
        compiler_params=pltpu.CompilerParams(
            dimension_semantics=("parallel",),
            vmem_limit_bytes=int(vmem_limit_bytes)),
    )(h_emb, p_feats, feats, mask_bias, wa_row)

    return vis[:, :D], pi[:, :L]


def attention_ref(h, feats, p_feats, masks, Wh, bh, wa, ba):
    """Plain-JAX reference mirroring the PyTorch forward."""
    h_embed = h @ Wh + bh.reshape(1, -1)                        # (B, A)
    hA = jnp.tanh(p_feats + h_embed[:, None, :])                # (B, L, A)
    scores = (hA @ wa)[..., 0] + ba                             # (B, L)
    if masks is not None:
        scores = jnp.where(masks == 0, -1.0e9, scores)
    PI = jax.nn.softmax(scores, axis=1)
    vis = jnp.einsum('bl,bld->bd', PI, feats)
    return vis, PI


if __name__ == "__main__":
    key = jax.random.PRNGKey(0)
    (k_h, k_f, k_pf, k_wh, k_bh, k_wa, k_ba,
     k_h2, k_f2, k_pf2) = jax.random.split(key, 10)

    # Small shapes consistent with the module.
    B, L = 2, 16           # batch, number of attendable locations
    R, A, D = 32, 64, 64   # rnn_size, att_hid_size, visual feature dim

    h = jax.random.normal(k_h, (B, R), dtype=jnp.float32)
    feats = jax.random.normal(k_f, (B, L, D), dtype=jnp.float32)
    p_feats = jax.random.normal(k_pf, (B, L, A), dtype=jnp.float32)
    lengths = jnp.array([L, 10], dtype=jnp.int32)
    masks = (jnp.arange(L)[None, :] < lengths[:, None]).astype(jnp.float32)

    bound_h = 1.0 / (R ** 0.5)
    bound_a = 1.0 / (A ** 0.5)
    Wh = jax.random.uniform(k_wh, (R, A), jnp.float32, -bound_h, bound_h)
    bh = jax.random.uniform(k_bh, (A,), jnp.float32, -bound_h, bound_h)
    wa = jax.random.uniform(k_wa, (A, 1), jnp.float32, -bound_a, bound_a)
    ba = jax.random.uniform(k_ba, (1,), jnp.float32, -bound_a, bound_a)

    # 1) f32 path, single block.
    vis, pi = attention_pallas(h, feats, p_feats, masks, Wh, bh, wa, ba)
    jax.block_until_ready((vis, pi))
    vis_r, pi_r = attention_ref(h, feats, p_feats, masks, Wh, bh, wa, ba)
    assert vis.shape == (B, D) and pi.shape == (B, L)
    assert jnp.allclose(pi, pi_r, atol=2e-3, rtol=2e-3)
    assert jnp.allclose(vis, vis_r, atol=2e-3, rtol=2e-3)

    # 2) Multi-block + ragged last block: B=20 with b_tile=8 (grid of 3,
    #    last block covers only 4 valid rows; no HBM padding of the features).
    B2 = 20
    h2 = jax.random.normal(k_h2, (B2, R), dtype=jnp.float32)
    feats2 = jax.random.normal(k_f2, (B2, L, D), dtype=jnp.float32)
    p_feats2 = jax.random.normal(k_pf2, (B2, L, A), dtype=jnp.float32)
    lengths2 = (jnp.arange(B2) % L) + 1
    masks2 = (jnp.arange(L)[None, :] < lengths2[:, None]).astype(jnp.float32)
    vis2, pi2 = attention_pallas(h2, feats2, p_feats2, masks2,
                                 Wh, bh, wa, ba, b_tile=8)
    jax.block_until_ready((vis2, pi2))
    vis2_r, pi2_r = attention_ref(h2, feats2, p_feats2, masks2, Wh, bh, wa, ba)
    assert jnp.allclose(pi2, pi2_r, atol=2e-3, rtol=2e-3)
    assert jnp.allclose(vis2, vis2_r, atol=2e-3, rtol=2e-3)

    # 3) bf16-resident features (caller casts once upstream); elementwise
    #    compute runs in bf16 on v6e/v7x, f32 on v5e.  Compare against the
    #    reference on the same bf16-rounded features with bf16-compute tolerance.
    feats_b = feats.astype(jnp.bfloat16)
    p_feats_b = p_feats.astype(jnp.bfloat16)
    vis_b, pi_b = attention_pallas(h, feats_b, p_feats_b, masks, Wh, bh, wa, ba)
    jax.block_until_ready((vis_b, pi_b))
    vis_rb, pi_rb = attention_ref(h, feats_b.astype(jnp.float32),
                                  p_feats_b.astype(jnp.float32),
                                  masks, Wh, bh, wa, ba)
    assert jnp.allclose(pi_b, pi_rb, atol=5e-2, rtol=5e-2)
    assert jnp.allclose(vis_b, vis_rb, atol=5e-2, rtol=5e-2)

    print("KERNEL_OK")
</pallas_src>

<mosaic_0001>
module attributes {stable_mosaic.version = 11 : i64} {
  func.func @_attention_kernel(%arg0: i32, %arg1: memref<2x64xf32, #tpu.memory_space<vmem>>, %arg2: memref<2x16x64xf32, #tpu.memory_space<vmem>>, %arg3: memref<2x16x64xf32, #tpu.memory_space<vmem>>, %arg4: memref<2x16xf32, #tpu.memory_space<vmem>>, %arg5: memref<1x64xf32, #tpu.memory_space<vmem>>, %arg6: memref<2x128xf32, #tpu.memory_space<vmem>>, %arg7: memref<2x128xf32, #tpu.memory_space<vmem>>) attributes {dimension_semantics = [#tpu.dimension_semantics<parallel>], iteration_bounds = array<i64: 1>, scalar_prefetch = 0 : i64, scratch_operands = 0 : i64, tpu.core_type = #tpu.core_type<tc>, window_params = [{transform_indices = @transform_0, window_bounds = array<i64: 2, 64>}, {transform_indices = @transform_1, window_bounds = array<i64: 2, 16, 64>}, {transform_indices = @transform_2, window_bounds = array<i64: 2, 16, 64>}, {transform_indices = @transform_3, window_bounds = array<i64: 2, 16>}, {pipeline_mode = #tpu.pipeline_mode<synchronous>, transform_indices = @transform_4, window_bounds = array<i64: 1, 64>}, {transform_indices = @transform_5, window_bounds = array<i64: 2, 128>}, {transform_indices = @transform_6, window_bounds = array<i64: 2, 128>}]} {
    %c0 = arith.constant 0 : index
    %c0_0 = arith.constant 0 : index
    %0 = vector.load %arg1[%c0, %c0_0] : memref<2x64xf32, #tpu.memory_space<vmem>>, vector<2x64xf32>
    %c0_1 = arith.constant 0 : index
    %c0_2 = arith.constant 0 : index
    %c0_3 = arith.constant 0 : index
    %1 = vector.load %arg2[%c0_1, %c0_2, %c0_3] : memref<2x16x64xf32, #tpu.memory_space<vmem>>, vector<2x16x64xf32>
    %2 = vector.shape_cast %0 : vector<2x64xf32> to vector<2x1x64xf32>
    %3 = vector.broadcast %2 : vector<2x1x64xf32> to vector<2x16x64xf32>
    %4 = arith.addf %1, %3 : vector<2x16x64xf32>
    %5 = math.tanh %4 : vector<2x16x64xf32>
    %c0_4 = arith.constant 0 : index
    %c0_5 = arith.constant 0 : index
    %6 = vector.load %arg5[%c0_4, %c0_5] : memref<1x64xf32, #tpu.memory_space<vmem>>, vector<1x64xf32>
    %7 = vector.shape_cast %6 : vector<1x64xf32> to vector<1x1x64xf32>
    %8 = vector.broadcast %7 : vector<1x1x64xf32> to vector<2x16x64xf32>
    %9 = arith.mulf %5, %8 : vector<2x16x64xf32>
    %cst = arith.constant dense<0.000000e+00> : vector<2x16xf32>
    %10 = vector.multi_reduction <add>, %9, %cst [2] : vector<2x16x64xf32> to vector<2x16xf32>
    %c0_6 = arith.constant 0 : index
    %c0_7 = arith.constant 0 : index
    %11 = vector.load %arg4[%c0_6, %c0_7] : memref<2x16xf32, #tpu.memory_space<vmem>>, vector<2x16xf32>
    %12 = arith.addf %10, %11 : vector<2x16xf32>
    %cst_8 = arith.constant dense<0xFF800000> : vector<2xf32>
    %13 = vector.multi_reduction <maximumf>, %12, %cst_8 [1] : vector<2x16xf32> to vector<2xf32>
    %14 = vector.shape_cast %13 : vector<2xf32> to vector<2x1xf32>
    %15 = vector.broadcast %14 : vector<2x1xf32> to vector<2x16xf32>
    %16 = arith.subf %12, %15 : vector<2x16xf32>
    %17 = math.exp %16 : vector<2x16xf32>
    %cst_9 = arith.constant dense<0.000000e+00> : vector<2xf32>
    %18 = vector.multi_reduction <add>, %17, %cst_9 [1] : vector<2x16xf32> to vector<2xf32>
    %19 = vector.shape_cast %18 : vector<2xf32> to vector<2x1xf32>
    %20 = tpu.reciprocal %19 {approx = true} : vector<2x1xf32> -> vector<2x1xf32>
    %21 = vector.broadcast %20 : vector<2x1xf32> to vector<2x16xf32>
    %22 = arith.mulf %17, %21 : vector<2x16xf32>
    %c0_10 = arith.constant 0 : index
    %c0_11 = arith.constant 0 : index
    %c0_12 = arith.constant 0 : index
    %23 = vector.load %arg3[%c0_10, %c0_11, %c0_12] : memref<2x16x64xf32, #tpu.memory_space<vmem>>, vector<2x16x64xf32>
    %24 = vector.shape_cast %22 : vector<2x16xf32> to vector<2x16x1xf32>
    %25 = vector.broadcast %24 : vector<2x16x1xf32> to vector<2x16x64xf32>
    %26 = arith.mulf %25, %23 : vector<2x16x64xf32>
    %cst_13 = arith.constant dense<0.000000e+00> : vector<2x64xf32>
    %27 = vector.multi_reduction <add>, %26, %cst_13 [1] : vector<2x16x64xf32> to vector<2x64xf32>
    %cst_14 = arith.constant 0.000000e+00 : f32
    %28 = vector.broadcast %cst_14 : f32 to vector<2x112xf32>
    %29 = tpu.concatenate %22, %28 in 1 : vector<2x16xf32>, vector<2x112xf32> -> vector<2x128xf32>
    %cst_15 = arith.constant 0.000000e+00 : f32
    %30 = vector.broadcast %cst_15 : f32 to vector<2x64xf32>
    %31 = tpu.concatenate %27, %30 in 1 : vector<2x64xf32>, vector<2x64xf32> -> vector<2x128xf32>
    %c0_16 = arith.constant 0 : index
    %c0_17 = arith.constant 0 : index
    %32 = vector.load %arg7[%c0_16, %c0_17] : memref<2x128xf32, #tpu.memory_space<vmem>>, vector<2x128xf32>
    tpu.vector_store %arg7[%c0_16, %c0_17], %29 {strides = array<i32>} : memref<2x128xf32, #tpu.memory_space<vmem>>, vector<2x128xf32>,
    %c0_18 = arith.constant 0 : index
    %c0_19 = arith.constant 0 : index
    %33 = vector.load %arg6[%c0_18, %c0_19] : memref<2x128xf32, #tpu.memory_space<vmem>>, vector<2x128xf32>
    tpu.vector_store %arg6[%c0_18, %c0_19], %31 {strides = array<i32>} : memref<2x128xf32, #tpu.memory_space<vmem>>, vector<2x128xf32>,
    return
  }
  func.func @transform_0(%arg0: i32) -> (i32, i32) {
    %c0_i32 = arith.constant 0 : i32
    %c0_i32_0 = arith.constant 0 : i32
    return %arg0, %c0_i32 : i32, i32
  }
  func.func @transform_1(%arg0: i32) -> (i32, i32, i32) {
    %c0_i32 = arith.constant 0 : i32
    %c0_i32_0 = arith.constant 0 : i32
    %c0_i32_1 = arith.constant 0 : i32
    return %arg0, %c0_i32, %c0_i32_0 : i32, i32, i32
  }
  func.func @transform_2(%arg0: i32) -> (i32, i32, i32) {
    %c0_i32 = arith.constant 0 : i32
    %c0_i32_0 = arith.constant 0 : i32
    %c0_i32_1 = arith.constant 0 : i32
    return %arg0, %c0_i32, %c0_i32_0 : i32, i32, i32
  }
  func.func @transform_3(%arg0: i32) -> (i32, i32) {
    %c0_i32 = arith.constant 0 : i32
    %c0_i32_0 = arith.constant 0 : i32
    return %arg0, %c0_i32 : i32, i32
  }
  func.func @transform_4(%arg0: i32) -> (i32, i32) {
    %c0_i32 = arith.constant 0 : i32
    %c0_i32_0 = arith.constant 0 : i32
    %c0_i32_1 = arith.constant 0 : i32
    return %c0_i32, %c0_i32_0 : i32, i32
  }
  func.func @transform_5(%arg0: i32) -> (i32, i32) {
    %c0_i32 = arith.constant 0 : i32
    %c0_i32_0 = arith.constant 0 : i32
    return %arg0, %c0_i32 : i32, i32
  }
  func.func @transform_6(%arg0: i32) -> (i32, i32) {
    %c0_i32 = arith.constant 0 : i32
    %c0_i32_0 = arith.constant 0 : i32
    return %arg0, %c0_i32 : i32, i32
  }
}

</mosaic_0001>

<bundles_post_ra>
// kernel: tpu_custom_call.1
= control target key start
LH: loop header
LB: loop body
LE: loop exit
PB: predicated region body
PF: predicated region fallthrough
CT: control target
= control target key end

     0   :  { %12 = vsyncpa [#allocation3], 0  ;;  %s716_s0 = inlined_call_operand.hbm [shape: f32[2,64], index: 0, kind: input, shape index: {}]   ;;  %s717_s1 = inlined_call_operand.hbm [shape: f32[2,16,64], index: 1, kind: input, shape index: {}]   ;;  %s718_s2 = inlined_call_operand.hbm [shape: f32[2,16,64], index: 2, kind: input, shape index: {}]   ;;  %s719_s3 = inlined_call_operand.vmem [shape: f32[2,16], index: 3, kind: input, shape index: {}]   ;;  %s720_s4 = inlined_call_operand.vmem [shape: f32[1,64], index: 4, kind: input, shape index: {}]   ;;  %s721_s5 = inlined_call_operand.hbm [shape: f32[2,128], index: 5, kind: output, shape index: {0}]   ;;  %s722_s6 = inlined_call_operand.hbm [shape: f32[2,128], index: 6, kind: output, shape index: {1}]  }
   0x1   :  { %13 = vsyncpa [#allocation6], 0 }
   0x2   :  { %14 = vsyncpa [#allocation4], 0 }
   0x3   :  { %15 = vsyncpa [#allocation10], 0  ;;  %s542_s21 = smov [#allocation5]   ;;  %s424_s25 = scalar_lea.hbm %s717_s1, 512 }
   0x4   :  { %s31_s22 = sshll.u32 %s542_s21, 4  ;;  %p425_p0 = scmp.ne.s32.totalorder %s717_s1, %s424_s25  ;;  %s32_s22 = int_to_ptr.vmem [resolvable:$true] %s31_s22 }
   0x5   :  { %p428_p1 = scmp.lt.u32.totalorder %s424_s25, %s717_s1 }
   0x7   :  { %p430_p2 = pnand %p428_p1, %p425_p0 }
   0x9   :  { %433 = shalt.err (!%p430_p2)
}
   0xa   :  { %s434_s30 = scalar_lea.vmem %s32_s22, 512  ;;  %p439_p4 = scmp.lt.s32.totalorder %s32_s22, %s32_s22 }
   0xb   :  { %p435_p3 = scmp.ne.s32.totalorder %s32_s22, %s434_s30  ;;  %p440_p5 = scmp.lt.s32.totalorder %s434_s30, %s434_s30 }
   0xd   :  { %p441_p6 = por %p440_p5, %p439_p4 }
   0xf   :  { %p442_p7 = pnand %p441_p6, %p435_p3 }
  0x11   :  { %445 = shalt.err (!%p442_p7)
}
  0x12   :  { %s543_s7 = smov 128   ;;  %s544_s8 = smov 8  }
  0x13   :  { %37 = dma.hbm_to_vmem [thread:$0]  %s717_s1, 512, %s32_s22, [#allocation6], %s543_s7, %s543_s7, %s544_s8  }
  0x14   :  { %s545_s11 = smov [#allocation2]   ;;  %s546_s13 = smov [#allocation7]  }
  0x15   :  { %s22_s12 = sshll.u32 %s545_s11, 4  ;;  %s43_s14 = sshll.u32 %s546_s13, 4  ;;  %s23_s12 = int_to_ptr.vmem [resolvable:$true] %s22_s12  ;;  %s44_s14 = int_to_ptr.vmem [resolvable:$true] %s43_s14 }
  0x16   :  { %s446_s17 = scalar_lea.hbm %s716_s0, 32 }
  0x17   :  { %p447_p8 = scmp.ne.s32.totalorder %s716_s0, %s446_s17  ;;  %p450_p9 = scmp.lt.u32.totalorder %s446_s17, %s716_s0 }
  0x19   :  { %p452_p10 = pnand %p450_p9, %p447_p8 }
  0x1b   :  { %455 = shalt.err (!%p452_p10)
}
  0x1c   :  { %s456_s1 = scalar_lea.vmem %s23_s12, 32  ;;  %p461_p12 = scmp.lt.s32.totalorder %s23_s12, %s23_s12 }
  0x1d   :  { %p457_p11 = scmp.ne.s32.totalorder %s23_s12, %s456_s1  ;;  %p462_p13 = scmp.lt.s32.totalorder %s456_s1, %s456_s1 }
  0x1f   :  { %p463_p0 = por %p462_p13, %p461_p12 }
  0x21   :  { %p464_p1 = pnand %p463_p0, %p457_p11 }
  0x23   :  { %467 = shalt.err (!%p464_p1)
}
  0x24   :  { %25 = dma.hbm_to_vmem [thread:$0]  %s716_s0, 32, %s23_s12, [#allocation3]  }
  0x25   :  { %s468_s26 = scalar_lea.hbm %s718_s2, 512 }
  0x26   :  { %p469_p2 = scmp.ne.s32.totalorder %s718_s2, %s468_s26  ;;  %p472_p3 = scmp.lt.u32.totalorder %s468_s26, %s718_s2 }
  0x28   :  { %p474_p4 = pnand %p472_p3, %p469_p2 }
  0x2a   :  { %477 = shalt.err (!%p474_p4)
}
  0x2b   :  { %s478_s9 = scalar_lea.vmem %s44_s14, 512  ;;  %p483_p6 = scmp.lt.s32.totalorder %s44_s14, %s44_s14 }
  0x2c   :  { %p479_p5 = scmp.ne.s32.totalorder %s44_s14, %s478_s9  ;;  %p484_p7 = scmp.lt.s32.totalorder %s478_s9, %s478_s9 }
  0x2e   :  { %p485_p8 = por %p484_p7, %p483_p6 }
  0x30   :  { %p486_p9 = pnand %p485_p8, %p479_p5 }
  0x32   :  { %489 = shalt.err (!%p486_p9)
}
  0x33   :  { %49 = dma.hbm_to_vmem [thread:$0]  %s718_s2, 512, %s44_s14, [#allocation6], %s543_s7, %s543_s7, %s544_s8  }
  0x34   :  { %534 = dma.done.wait [#allocation3], 32  }
  0x35   :  { %535 = vsyncadd [#allocation3], 4294967264 }
  0x36   :  { %536 = dma.done.wait [#allocation6], 1024  }
  0x37   :  { %537 = vsyncadd [#allocation6], 4294966272  ;;  %v80_v0 = vlaneseq  ;;  %v547_v1 = vmov 1966171168   ;;  %v133_v8 = vld [vmem:[%s719_s3] sm:$0x3] }
  0x38   :  { %v78_v2 = vunpack.c.l.s4 %v547_v1  ;;  %v393_v9 = vld.sshfl [vmem:[#allocation2] sm:$0x11 pattern:$0x75316420]  ;;  %v64_v12 = vld [vmem:[#allocation5] sm:$0xff]  ;;  %v65_v13 = vld [vmem:[#allocation5 + $0x8] sm:$0xff] }
  0x39   :  { %v629_v3 = vshrl.u32 %v80_v0, 7  ;;  %v76_v18 = vcombine.high %v393_v9, %v393_v9  ;;  %v394_v20 = vld [vmem:[%s720_s4] ss:$0 sm:$0xff]  ;;  %v66_v22 = vld [vmem:[#allocation5 + $0x10] sm:$0xff]  ;;  %vm120_vm0 = vcmask 523264   ;;  %v548_v37 = vmov 0  }
  0x3a   :  { %v79_v4 = vunpack.c.0.s8 %v78_v2  ;;  %v67_v29 = vld [vmem:[#allocation5 + $0x18] sm:$0xff]  ;;  %405 = vset.pattern.permute.xlu1 %v548_v37  ;;  %404 = vset.pattern.permute.xlu0 %v548_v37  ;;  %v182_v51 = vand.u32 127, %v80_v0  ;;  %vm192_vm1 = vcmask 130112   ;;  %vm203_vm2 = vcmask 1041409   ;;  %s549_s4 = smov [#allocation9]  }
  0x3b   :  { %v632_v5 = vsub.s32 0, %v629_v3  ;;  %v636_v7 = vsub.s32 1, %v629_v3  ;;  %vm206_vm3 = vcmask 123904   ;;  %s379_s11 = sshll.u32 %s549_s4, 4  ;;  %vm354_vm4 = vcmask 130048   ;;  %s380_s11 = int_to_ptr.vmem [resolvable:$true] %s379_s11 }
  0x3c   :  { %v82_v6 = vsub.s32 %v79_v4, %v629_v3  ;;  %v187_v52 = vadd.s32 4294967288, %v182_v51  ;;  %v654_v54 = vsub.s32 %v182_v51, %v629_v3  ;;  %s490_s12 = scalar_lea.vmem %s380_s11, 32  ;;  %p495_p11 = scmp.lt.s32.totalorder %s380_s11, %s380_s11 }
  0x3d   :  { %v138_v10 = vrot.slane %v133_v8, %v632_v5  ;;  %v149_v14 = vrot.slane %v133_v8, %v636_v7  ;;  %p491_p10 = scmp.ne.s32.totalorder %s380_s11, %s490_s12  ;;  %p496_p12 = scmp.lt.s32.totalorder %s490_s12, %s490_s12 }
  0x3e   :  { %v83_v11 = vrot.slane %v393_v9, %v82_v6  ;;  %v90_v19 = vrot.slane %v76_v18, %v82_v6  ;;  %v657_v56 = vsub.s32 %v187_v52, %v629_v3 }
  0x3f   :  { %144 = vbcast.lane.b32.xlu1 %v138_v10, 264  ;;  %p497_p13 = por %p496_p12, %p495_p11 }
  0x40   :  { %v94_v15 = vrot.slane %v83_v11, %v632_v5  ;;  %v98_v21 = vrot.slane %v90_v19, %v632_v5 }
  0x41   :  { %p498_p0 = pnand %p497_p13, %p491_p10 }
  0x42   :  { %v101_v16 = vadd.f32 %v94_v15, %v64_v12  ;;  %v102_v17 = vadd.f32 %v94_v15, %v65_v13  ;;  %v103_v27 = vadd.f32 %v98_v21, %v66_v22  ;;  %v104_v31 = vadd.f32 %v98_v21, %v67_v29 }
  0x43   :  { %151 = vbcast.lane.b32.xlu1 %v149_v14, 256 }
  0x44   :  { %406 = vtanh.f32 %v101_v16 }
  0x45   :  { %408 = vtanh.f32 %v102_v17 }
  0x46   :  { %410 = vtanh.f32 %v103_v27 }
  0x47   :  { %412 = vtanh.f32 %v104_v31 }
  0x4e   :  { %v407_v23 = vpop.eup %406 }
  0x4f   :  { %v409_v24 = vpop.eup %408  ;;  %v116_v25 = vmul.f32 %v407_v23, %v394_v20 }
  0x50   :  { %v117_v26 = vmul.f32 %v409_v24, %v394_v20  ;;  %v411_v32 = vpop.eup %410 }
  0x51   :  { %v121_v28 = vsel %vm120_vm0, %v116_v25, 0.0  ;;  %v118_v33 = vmul.f32 %v411_v32, %v394_v20  ;;  %v413_v34 = vpop.eup %412 }
  0x52   :  { %122 = vadd.xlane.f32.xlu0 %v121_v28  ;;  %v124_v30 = vsel %vm120_vm0, %v117_v26, 0.0  ;;  %v119_v36 = vmul.f32 %v413_v34, %v394_v20 }
  0x53   :  { %v127_v35 = vsel %vm120_vm0, %v118_v33, 0.0 }
  0x54   :  { %v130_v38 = vsel %vm120_vm0, %v119_v36, 0.0 }
  0x56   :  { %125 = vadd.xlane.f32.xlu0 %v124_v30 }
  0x67   :  { %128 = vadd.xlane.f32.xlu1 %v127_v35 }
  0x6b   :  { %131 = vadd.xlane.f32.xlu1 %v130_v38 }
  0x6c   :  { %140 = vbcast.lane.b32.xlu0 %v138_v10, 256 }
  0x7c   :  { %155 = vbcast.lane.b32.xlu1 %v149_v14, 264 }
  0xb1   :  { %v145_v40 = vpop.permute.xlu1 %144 }
  0xb5   :  { %v152_v45 = vpop.permute.xlu1 %151 }
  0xdf   :  { %v123_v39 = vpop.xlane.xlu0 %122 }
  0xe3   :  { %v126_v41 = vpop.xlane.xlu0 %125 }
  0xe4   :  { %v162_v42 = vadd.f32 %v145_v40, %v126_v41  ;;  %v289_v40 = vld [vmem:[#allocation7 + $0x8] sm:$0xff]  ;;  %v288_v41 = vld [vmem:[#allocation7] sm:$0xff] }
  0xe6   :  { %173 = vperm.xlu1 %405, %v162_v42  }
  0xe7   :  { %v141_v43 = vpop.permute.xlu0 %140 }
  0xe8   :  { %v161_v44 = vadd.f32 %v141_v43, %v123_v39 }
  0xea   :  { %170 = vperm.xlu0 %404, %v161_v44  }
  0xf4   :  { %v129_v46 = vpop.xlane.xlu1 %128 }
  0xf5   :  { %v163_v47 = vadd.f32 %v152_v45, %v129_v46 }
  0xf7   :  { %176 = vperm.xlu1 %405, %v163_v47  }
  0xf8   :  { %v132_v48 = vpop.xlane.xlu1 %131 }
  0xfc   :  { %v156_v49 = vpop.permute.xlu1 %155 }
  0xfd   :  { %v164_v50 = vadd.f32 %v156_v49, %v132_v48  ;;  %v290_v48 = vld [vmem:[#allocation7 + $0x10] sm:$0xff] }
  0xff   :  { %179 = vperm.xlu0 %404, %v164_v50  }
 0x165   :  { %v174_v53 = vpop.permute.xlu1 %173 }
 0x166   :  { %v191_v60 = vrot.slane %v174_v53, %v657_v56 }
 0x169   :  { %v171_v55 = vpop.permute.xlu0 %170 }
 0x16a   :  { %v186_v58 = vrot.slane %v171_v55, %v654_v54 }
 0x16c   :  { %v193_v63 = vsel %vm192_vm1, %v191_v60, %v186_v58 }
 0x176   :  { %v177_v57 = vpop.permute.xlu1 %176 }
 0x177   :  { %v197_v61 = vrot.slane %v177_v57, %v654_v54 }
 0x17e   :  { %v180_v59 = vpop.permute.xlu0 %179 }
 0x17f   :  { %v201_v62 = vrot.slane %v180_v59, %v657_v56 }
 0x181   :  { %v202_v0 = vsel %vm192_vm1, %v201_v62, %v197_v61 }
 0x182   :  { %v204_v1 = vsel %vm203_vm2, %v202_v0, %v193_v63 }
 0x183   :  { %v207_v2 = vsel %vm206_vm3, %v204_v1, -inf }
 0x184   :  { %208 = vmax.xlane.f32.xlu1 %v207_v2 }
 0x211   :  { %v209_v3 = vpop.xlane.xlu1 %208 }
 0x212   :  { %v214_v4 = vrot.slane %v209_v3, %v632_v5  ;;  %v218_v6 = vrot.slane %v209_v3, %v636_v7 }
 0x214   :  { %v221_v8 = vsub.f32 %v161_v44, %v214_v4  ;;  %v222_v9 = vsub.f32 %v162_v42, %v214_v4  ;;  %v223_v11 = vsub.f32 %v163_v47, %v218_v6  ;;  %v224_v13 = vsub.f32 %v164_v50, %v218_v6  ;;  %v291_v50 = vld [vmem:[#allocation7 + $0x18] sm:$0xff] }
 0x216   :  { %v225_v10 = vmul.f32 1.442695, %v221_v8  ;;  %v227_v12 = vmul.f32 1.442695, %v222_v9  ;;  %v229_v14 = vmul.f32 1.442695, %v223_v11 }
 0x217   :  { %v231_v15 = vmul.f32 1.442695, %v224_v13 }
 0x218   :  { %414 = vpow2.f32 %v225_v10 }
 0x219   :  { %416 = vpow2.f32 %v227_v12 }
 0x21a   :  { %418 = vpow2.f32 %v229_v14 }
 0x21b   :  { %420 = vpow2.f32 %v231_v15 }
 0x222   :  { %v415_v16 = vpop.eup %414 }
 0x223   :  { %238 = vperm.xlu0 %404, %v415_v16   ;;  %v417_v17 = vpop.eup %416 }
 0x224   :  { %v419_v18 = vpop.eup %418 }
 0x225   :  { %v421_v19 = vpop.eup %420 }
 0x227   :  { %241 = vperm.xlu0 %404, %v417_v17  }
 0x22b   :  { %244 = vperm.xlu0 %404, %v419_v18  }
 0x22f   :  { %247 = vperm.xlu0 %404, %v421_v19  }
 0x2a2   :  { %v239_v20 = vpop.permute.xlu0 %238 }
 0x2a3   :  { %v252_v25 = vrot.slane %v239_v20, %v654_v54 }
 0x2a6   :  { %v242_v21 = vpop.permute.xlu0 %241 }
 0x2a7   :  { %v256_v23 = vrot.slane %v242_v21, %v657_v56 }
 0x2a9   :  { %v257_v28 = vsel %vm192_vm1, %v256_v23, %v252_v25 }
 0x2aa   :  { %v245_v22 = vpop.permute.xlu0 %244 }
 0x2ab   :  { %v261_v26 = vrot.slane %v245_v22, %v654_v54 }
 0x2ae   :  { %v248_v24 = vpop.permute.xlu0 %247 }
 0x2af   :  { %v265_v27 = vrot.slane %v248_v24, %v657_v56 }
 0x2b1   :  { %v266_v29 = vsel %vm192_vm1, %v265_v27, %v261_v26 }
 0x2b2   :  { %v267_v30 = vsel %vm203_vm2, %v266_v29, %v257_v28 }
 0x2b3   :  { %v269_v31 = vsel %vm206_vm3, %v267_v30, 0.0 }
 0x2b4   :  { %270 = vadd.xlane.f32.xlu0 %v269_v31 }
 0x341   :  { %v271_v32 = vpop.xlane.xlu0 %270 }
 0x342   :  { %422 = vrcp.f32 %v271_v32 }
 0x34c   :  { %v423_v33 = vpop.eup %422 }
 0x34d   :  { %v277_v34 = vrot.slane %v423_v33, %v632_v5  ;;  %v281_v37 = vrot.slane %v423_v33, %v636_v7 }
 0x34f   :  { %v285_v35 = vmul.f32 %v417_v17, %v277_v34  ;;  %v284_v36 = vmul.f32 %v415_v16, %v277_v34  ;;  %v286_v38 = vmul.f32 %v419_v18, %v281_v37  ;;  %v287_v39 = vmul.f32 %v421_v19, %v281_v37 }
 0x351   :  { %299 = vperm.xlu0 %404, %v285_v35   ;;  %294 = vperm.xlu1 %405, %v284_v36  }
 0x355   :  { %304 = vperm.xlu1 %405, %v286_v38  }
 0x359   :  { %309 = vperm.xlu1 %405, %v287_v39  }
 0x3d0   :  { %v300_v42 = vpop.permute.xlu0 %299  ;;  %v295_v43 = vpop.permute.xlu1 %294 }
 0x3d1   :  { %v313_v44 = vmul.f32 %v300_v42, %v289_v40  ;;  %v312_v45 = vmul.f32 %v295_v43, %v288_v41  ;;  %v341_v51 = vrot.slane %v300_v42, %v657_v56  ;;  %v337_v52 = vrot.slane %v295_v43, %v654_v54 }
 0x3d3   :  { %v317_v46 = vsel %vm120_vm0, %v313_v44, 0.0  ;;  %v316_v5 = vsel %vm120_vm0, %v312_v45, 0.0  ;;  %v342_v0 = vsel %vm192_vm1, %v341_v51, %v337_v52 }
 0x3d4   :  { %v318_v47 = vadd.f32 %v317_v46, %v316_v5  ;;  %v305_v49 = vpop.permute.xlu1 %304 }
 0x3d5   :  { %v314_v53 = vmul.f32 %v305_v49, %v290_v48  ;;  %v346_v58 = vrot.slane %v305_v49, %v654_v54 }
 0x3d6   :  { %v319_v7 = vrot.slane %v318_v47, 4 }
 0x3d7   :  { %v325_v61 = vsel %vm120_vm0, %v314_v53, 0.0 }
 0x3d8   :  { %v320_v55 = vadd.f32 %v319_v7, %v318_v47  ;;  %v310_v57 = vpop.permute.xlu1 %309 }
 0x3d9   :  { %v315_v59 = vmul.f32 %v310_v57, %v291_v50  ;;  %v350_v60 = vrot.slane %v310_v57, %v657_v56 }
 0x3da   :  { %v321_v1 = vrot.slane %v320_v55, 2 }
 0x3db   :  { %v326_v62 = vsel %vm120_vm0, %v315_v59, 0.0  ;;  %v351_v63 = vsel %vm192_vm1, %v350_v60, %v346_v58 }
 0x3dc   :  { %v327_v2 = vadd.f32 %v326_v62, %v325_v61  ;;  %v352_v3 = vsel %vm203_vm2, %v351_v63, %v342_v0 }
 0x3dd   :  { %v355_v54 = vsel %vm354_vm4, %v352_v3, 0.0 }
 0x3de   :  { %v328_v4 = vrot.slane %v327_v2, 4  ;;  %361 = vst [vmem:[#allocation9] sm:$0x3] %v355_v54 }
 0x3df   :  { %501 = shalt.err (!%p498_p0)
}
 0x3e0   :  { %s502_s15 = scalar_lea.hbm %s722_s6, 32 }
 0x3e1   :  { %p503_p1 = scmp.ne.s32.totalorder %s722_s6, %s502_s15  ;;  %p506_p2 = scmp.lt.u32.totalorder %s502_s15, %s722_s6 }
 0x3e3   :  { %p508_p3 = pnand %p506_p2, %p503_p1 }
 0x3e5   :  { %511 = shalt.err (!%p508_p3)
}
 0x3e6   :  { %382 = dma.vmem_to_hbm [thread:$0]  %s380_s11, 32, %s722_s6, [#allocation10]   ;;  %v322_v56 = vadd.f32 %v321_v1, %v320_v55  ;;  %v329_v6 = vadd.f32 %v328_v4, %v327_v2 }
 0x3e7   :  { %s550_s1 = smov [#allocation8]  }
 0x3e8   :  { %v330_v8 = vrot.slane %v329_v6, 2  ;;  %v323_v10 = vrot.slane %v322_v56, 1  ;;  %s369_s22 = sshll.u32 %s550_s1, 4  ;;  %s370_s22 = int_to_ptr.vmem [resolvable:$true] %s369_s22 }
 0x3e9   :  { %s512_s23 = scalar_lea.vmem %s370_s22, 32  ;;  %p517_p5 = scmp.lt.s32.totalorder %s370_s22, %s370_s22 }
 0x3ea   :  { %v331_v9 = vadd.f32 %v330_v8, %v329_v6  ;;  %v324_v12 = vadd.f32 %v323_v10, %v322_v56  ;;  %p513_p4 = scmp.ne.s32.totalorder %s370_s22, %s512_s23  ;;  %p518_p6 = scmp.lt.s32.totalorder %s512_s23, %s512_s23 }
 0x3ec   :  { %v332_v11 = vrot.slane %v331_v9, 1  ;;  %p519_p7 = por %p518_p6, %p517_p5 }
 0x3ee   :  { %v333_v13 = vadd.f32 %v332_v11, %v331_v9  ;;  %p520_p8 = pnand %p519_p7, %p513_p4 }
 0x3f0   :  { %v358_v14 = vsel %vm203_vm2, %v333_v13, %v324_v12 }
 0x3f1   :  { %v360_v15 = vsel %vm120_vm0, %v358_v14, 0.0 }
 0x3f2   :  { %362 = vst [vmem:[#allocation8] sm:$0x3] %v360_v15 }
 0x3f3   :  { %523 = shalt.err (!%p520_p8)
}
 0x3f4   :  { %s524_s25 = scalar_lea.hbm %s721_s5, 32 }
 0x3f5   :  { %p525_p9 = scmp.ne.s32.totalorder %s721_s5, %s524_s25  ;;  %p528_p10 = scmp.lt.u32.totalorder %s524_s25, %s721_s5 }
 0x3f7   :  { %p530_p11 = pnand %p528_p10, %p525_p9 }
 0x3f9   :  { %533 = shalt.err (!%p530_p11)
}
 0x3fa   :  { %372 = dma.vmem_to_hbm [thread:$0]  %s370_s22, 32, %s721_s5, [#allocation4]  }
 0x3fb   :  { %538 = dma.done.wait [#allocation4], 32  }
 0x3fc   :  { %539 = vsyncadd [#allocation4], 4294967264 }
 0x3fd   :  { %540 = dma.done.wait [#allocation10], 32  }
 0x3fe   :  { %541 = vsyncadd [#allocation10], 4294967264 }
 0x3ff   :  { %389 = vsyncpa [#allocation3], 1 }
 0x400   :  { %390 = vsyncpa [#allocation6], 1 }
 0x401   :  { %391 = vsyncpa [#allocation4], 1 }
 0x402   :  { %392 = vsyncpa [#allocation10], 1 }

</bundles_post_ra>
